<compile_context>
chip_gen: v7x
topology: tpu7x:2x2x1
jax: 0.10.0
libtpu: 0.0.40
codegen_flags: <defaults>
</compile_context>

<pallas_src>
import functools

import jax
import jax.numpy as jnp
from jax import lax
from jax.experimental import pallas as pl
from jax.experimental.pallas import tpu as pltpu


# ----------------------------------------------------------------------------
# Kernel: one batch tile (feature-major) per grid step.  All weights resident.
# Ref order: euG, eiG, euM, eiM,
#            W1_user, W1_item, b1, (W_l, b_l) for l >= 2,
#            Wp_gmf, Wp_mlp, bp, out.
# Weights are in PyTorch layout [out, in]; biases are columns [out, 1].
# ----------------------------------------------------------------------------
def neumf_kernel(*refs, num_hidden):
    euG, eiG, euM, eiM = refs[0], refs[1], refs[2], refs[3]
    out_ref = refs[-1]
    p = refs[4:-1]
    f32 = jnp.float32

    # GMF branch: elementwise product in f32 (v5e-safe), shape [d_gmf, tile_b].
    gmf = euG[...].astype(f32) * eiG[...].astype(f32)

    # MLP layer 0 in split-weight form (avoids materializing the concat of the
    # two MLP embeddings): h = W1_u @ eu + W1_i @ ei + b1.
    w1u, w1i, b1 = p[0], p[1], p[2]
    h = (jnp.dot(w1u[...].astype(f32), euM[...].astype(f32),
                 preferred_element_type=f32)
         + jnp.dot(w1i[...].astype(f32), eiM[...].astype(f32),
                   preferred_element_type=f32)
         + b1[...].astype(f32))
    h = jnp.maximum(h, 0.0)

    # Remaining Linear + ReLU layers (dropout == identity at inference).
    for li in range(1, num_hidden):
        w = p[3 + 2 * (li - 1)]
        b = p[4 + 2 * (li - 1)]
        h = (jnp.dot(w[...].astype(f32), h, preferred_element_type=f32)
             + b[...].astype(f32))
        h = jnp.maximum(h, 0.0)

    # Prediction layer with the weight split into its GMF / MLP halves, so no
    # in-kernel concat is needed and the result is already a lane-dense row.
    wpg, wpm, bp = p[-3], p[-2], p[-1]
    pred = (jnp.dot(wpg[...].astype(f32), gmf, preferred_element_type=f32)
            + jnp.dot(wpm[...].astype(f32), h, preferred_element_type=f32)
            + bp[...].astype(f32))                      # (1, tile_b)
    out_ref[...] = pred.astype(out_ref.dtype)


def neumf_forward(euG_T, eiG_T, euM_T, eiM_T, mlp_params, wp, bp, *,
                  tile_b=256):
    """Feature-major activations:
      euG_T / eiG_T : [d_gmf, B]     (bf16)
      euM_T / eiM_T : [d_mlp, B]     (bf16)
    mlp_params: list of (W [out, in], b [out, 1])   (PyTorch layout, bf16)
    wp: [1, d_gmf + h_last]  (GMF columns first, matching torch.cat order)
    bp: [1, 1]
    Returns f32 predictions of shape [B]."""
    d_gmf, B = euG_T.shape
    d_mlp = euM_T.shape[0]

    num_tiles = pl.cdiv(B, tile_b)
    B_pad = num_tiles * tile_b
    if B_pad != B:
        pad = ((0, 0), (0, B_pad - B))
        euG_T = jnp.pad(euG_T, pad)
        eiG_T = jnp.pad(eiG_T, pad)
        euM_T = jnp.pad(euM_T, pad)
        eiM_T = jnp.pad(eiM_T, pad)

    # Split layer-0 and predict weights so the kernel never concatenates.
    w1, b1 = mlp_params[0]
    w1u, w1i = w1[:, :d_mlp], w1[:, d_mlp:]
    wpg, wpm = wp[:, :d_gmf], wp[:, d_gmf:]

    act_spec = lambda d: pl.BlockSpec((d, tile_b), lambda i: (0, i))
    const_spec = lambda arr: pl.BlockSpec(arr.shape, lambda i: (0, 0))

    flat = [w1u, w1i, b1]
    for (w, b) in mlp_params[1:]:
        flat += [w, b]
    flat += [wpg, wpm, bp]

    in_specs = ([act_spec(d_gmf), act_spec(d_gmf),
                 act_spec(d_mlp), act_spec(d_mlp)]
                + [const_spec(a) for a in flat])
    out_spec = pl.BlockSpec((1, tile_b), lambda i: (0, i))   # lane-dense rows

    kernel = functools.partial(neumf_kernel, num_hidden=len(mlp_params))
    out = pl.pallas_call(
        kernel,
        out_shape=jax.ShapeDtypeStruct((1, B_pad), jnp.float32),
        grid_spec=pltpu.PrefetchScalarGridSpec(
            num_scalar_prefetch=0,
            grid=(num_tiles,),
            in_specs=in_specs,
            out_specs=out_spec,
        ),
        compiler_params=pltpu.CompilerParams(
            dimension_semantics=("parallel",)),
    )(euG_T, eiG_T, euM_T, eiM_T, *flat)
    return out.reshape(-1)[:B]   # matches prediction.view(-1)


# ----------------------------------------------------------------------------
# Deterministic parameter initialization (mirrors nn.init usage in __init__),
# stored in bf16 (halves HBM traffic; compute stays f32).
# ----------------------------------------------------------------------------
def init_params(key, user_num, item_num, d_gmf, d_mlp, hidden_layers,
                dtype=jnp.bfloat16):
    n_keys = 4 + len(hidden_layers) + 1
    ks = iter(jax.random.split(key, n_keys))

    def normal(shape, std=0.01):
        return (std * jax.random.normal(next(ks), shape,
                                        dtype=jnp.float32)).astype(dtype)

    def xavier_uniform(fan_in, fan_out):
        bound = (6.0 / (fan_in + fan_out)) ** 0.5
        return jax.random.uniform(next(ks), (fan_out, fan_in),       # [out, in]
                                  minval=-bound, maxval=bound,
                                  dtype=jnp.float32).astype(dtype)

    def kaiming_uniform(fan_in, fan_out, a=1.0):
        gain = (2.0 / (1.0 + a * a)) ** 0.5
        bound = gain * (3.0 / fan_in) ** 0.5
        return jax.random.uniform(next(ks), (fan_out, fan_in),       # [out, in]
                                  minval=-bound, maxval=bound,
                                  dtype=jnp.float32).astype(dtype)

    params = {
        "embed_user_GMF": normal((user_num, d_gmf)),
        "embed_item_GMF": normal((item_num, d_gmf)),
        "embed_user_MLP": normal((user_num, d_mlp)),
        "embed_item_MLP": normal((item_num, d_mlp)),
    }
    mlp = []
    in_dim = 2 * d_mlp
    for h in hidden_layers:
        w = xavier_uniform(in_dim, h)          # [h, in_dim]
        b = jnp.zeros((h, 1), dtype)           # column bias (feature-major)
        mlp.append((w, b))
        in_dim = h
    params["mlp"] = mlp
    params["predict_w"] = kaiming_uniform(hidden_layers[-1] + d_gmf, 1, a=1.0)
    params["predict_b"] = jnp.zeros((1, 1), dtype)
    return params


def neumf_reference(params, user, item):
    """Pure-JAX reference (f32 math on the same bf16-stored parameters)."""
    f32 = jnp.float32
    hp = lax.Precision.HIGHEST
    eu_g = jnp.take(params["embed_user_GMF"], user, axis=0).astype(f32)
    ei_g = jnp.take(params["embed_item_GMF"], item, axis=0).astype(f32)
    gmf = eu_g * ei_g
    eu_m = jnp.take(params["embed_user_MLP"], user, axis=0).astype(f32)
    ei_m = jnp.take(params["embed_item_MLP"], item, axis=0).astype(f32)
    h = jnp.concatenate([eu_m, ei_m], axis=-1)
    for (w, b) in params["mlp"]:
        h = jnp.maximum(
            jnp.dot(h, w.astype(f32).T, precision=hp) + b.astype(f32).reshape(1, -1),
            0.0)
    concat = jnp.concatenate([gmf, h], axis=-1)
    wp = params["predict_w"].astype(f32)
    bp = params["predict_b"].astype(f32)
    return (jnp.dot(concat, wp.T, precision=hp) + bp).reshape(-1)


if __name__ == "__main__":
    # Small deterministic problem; B is deliberately not a multiple of tile_b
    # to exercise the padding path, and the grid has >= 2 parallel steps.
    user_num, item_num = 64, 96
    d_gmf, d_mlp = 16, 16
    hidden_layers = [64, 32, 16]
    dropout = 0.0   # identity at inference; no RNG masking in the kernel
    B = 500
    tile_b = 256    # multiple of 128 (v5e) and 256 (v6e/v7x)

    key = jax.random.PRNGKey(0)
    k_par, k_u, k_i = jax.random.split(key, 3)
    params = init_params(k_par, user_num, item_num, d_gmf, d_mlp, hidden_layers)

    user = jax.random.randint(k_u, (B,), 0, user_num, dtype=jnp.int32)
    item = jax.random.randint(k_i, (B,), 0, item_num, dtype=jnp.int32)

    # Glue: embedding gathers (bf16) in feature-major [d, B] layout.
    euG_T = jnp.take(params["embed_user_GMF"], user, axis=0).T
    eiG_T = jnp.take(params["embed_item_GMF"], item, axis=0).T
    euM_T = jnp.take(params["embed_user_MLP"], user, axis=0).T
    eiM_T = jnp.take(params["embed_item_MLP"], item, axis=0).T

    pred = neumf_forward(euG_T, eiG_T, euM_T, eiM_T, params["mlp"],
                         params["predict_w"], params["predict_b"],
                         tile_b=tile_b)
    pred = jax.block_until_ready(pred)

    ref = neumf_reference(params, user, item)
    assert pred.shape == (B,)
    max_err = float(jnp.max(jnp.abs(pred - ref)))
    assert jnp.allclose(pred, ref, atol=5e-5, rtol=5e-3), max_err
    print("KERNEL_OK")
</pallas_src>

<mosaic_0001>
module attributes {stable_mosaic.version = 11 : i64} {
  func.func @neumf_kernel(%arg0: i32, %arg1: memref<16x256xbf16, #tpu.memory_space<vmem>>, %arg2: memref<16x256xbf16, #tpu.memory_space<vmem>>, %arg3: memref<16x256xbf16, #tpu.memory_space<vmem>>, %arg4: memref<16x256xbf16, #tpu.memory_space<vmem>>, %arg5: memref<64x16xbf16, #tpu.memory_space<vmem>>, %arg6: memref<64x16xbf16, #tpu.memory_space<vmem>>, %arg7: memref<64x1xbf16, #tpu.memory_space<vmem>>, %arg8: memref<32x64xbf16, #tpu.memory_space<vmem>>, %arg9: memref<32x1xbf16, #tpu.memory_space<vmem>>, %arg10: memref<16x32xbf16, #tpu.memory_space<vmem>>, %arg11: memref<16x1xbf16, #tpu.memory_space<vmem>>, %arg12: memref<1x16xbf16, #tpu.memory_space<vmem>>, %arg13: memref<1x16xbf16, #tpu.memory_space<vmem>>, %arg14: memref<1x1xbf16, #tpu.memory_space<vmem>>, %arg15: memref<1x256xf32, #tpu.memory_space<vmem>>) attributes {dimension_semantics = [#tpu.dimension_semantics<parallel>], iteration_bounds = array<i64: 2>, scalar_prefetch = 0 : i64, scratch_operands = 0 : i64, tpu.core_type = #tpu.core_type<tc>, window_params = [{transform_indices = @transform_0, window_bounds = array<i64: 16, 256>}, {transform_indices = @transform_1, window_bounds = array<i64: 16, 256>}, {transform_indices = @transform_2, window_bounds = array<i64: 16, 256>}, {transform_indices = @transform_3, window_bounds = array<i64: 16, 256>}, {pipeline_mode = #tpu.pipeline_mode<synchronous>, transform_indices = @transform_4, window_bounds = array<i64: 64, 16>}, {pipeline_mode = #tpu.pipeline_mode<synchronous>, transform_indices = @transform_5, window_bounds = array<i64: 64, 16>}, {pipeline_mode = #tpu.pipeline_mode<synchronous>, transform_indices = @transform_6, window_bounds = array<i64: 64, 1>}, {pipeline_mode = #tpu.pipeline_mode<synchronous>, transform_indices = @transform_7, window_bounds = array<i64: 32, 64>}, {pipeline_mode = #tpu.pipeline_mode<synchronous>, transform_indices = @transform_8, window_bounds = array<i64: 32, 1>}, {pipeline_mode = #tpu.pipeline_mode<synchronous>, transform_indices = @transform_9, window_bounds = array<i64: 16, 32>}, {pipeline_mode = #tpu.pipeline_mode<synchronous>, transform_indices = @transform_10, window_bounds = array<i64: 16, 1>}, {pipeline_mode = #tpu.pipeline_mode<synchronous>, transform_indices = @transform_11, window_bounds = array<i64: 1, 16>}, {pipeline_mode = #tpu.pipeline_mode<synchronous>, transform_indices = @transform_12, window_bounds = array<i64: 1, 16>}, {pipeline_mode = #tpu.pipeline_mode<synchronous>, transform_indices = @transform_13, window_bounds = array<i64: 1, 1>}, {transform_indices = @transform_14, window_bounds = array<i64: 1, 256>}]} {
    %c0 = arith.constant 0 : index
    %c0_0 = arith.constant 0 : index
    %0 = vector.load %arg1[%c0, %c0_0] : memref<16x256xbf16, #tpu.memory_space<vmem>>, vector<16x256xbf16>
    %1 = arith.extf %0 : vector<16x256xbf16> to vector<16x256xf32>
    %c0_1 = arith.constant 0 : index
    %c0_2 = arith.constant 0 : index
    %2 = vector.load %arg2[%c0_1, %c0_2] : memref<16x256xbf16, #tpu.memory_space<vmem>>, vector<16x256xbf16>
    %3 = arith.extf %2 : vector<16x256xbf16> to vector<16x256xf32>
    %4 = arith.mulf %1, %3 : vector<16x256xf32>
    %c0_3 = arith.constant 0 : index
    %c0_4 = arith.constant 0 : index
    %5 = vector.load %arg5[%c0_3, %c0_4] : memref<64x16xbf16, #tpu.memory_space<vmem>>, vector<64x16xbf16>
    %6 = arith.extf %5 : vector<64x16xbf16> to vector<64x16xf32>
    %c0_5 = arith.constant 0 : index
    %c0_6 = arith.constant 0 : index
    %7 = vector.load %arg3[%c0_5, %c0_6] : memref<16x256xbf16, #tpu.memory_space<vmem>>, vector<16x256xbf16>
    %8 = arith.extf %7 : vector<16x256xbf16> to vector<16x256xf32>
    %cst = arith.constant dense<0.000000e+00> : vector<64x256xf32>
    %9 = tpu.matmul %6, %8, %cst {dimension_numbers = #tpu.dot_dimension_numbers<[1], [0], [0], [1], [0, 0, 1, 1], [], []>} : vector<64x16xf32>, vector<16x256xf32>, vector<64x256xf32> -> vector<64x256xf32>
    %c0_7 = arith.constant 0 : index
    %c0_8 = arith.constant 0 : index
    %10 = vector.load %arg6[%c0_7, %c0_8] : memref<64x16xbf16, #tpu.memory_space<vmem>>, vector<64x16xbf16>
    %11 = arith.extf %10 : vector<64x16xbf16> to vector<64x16xf32>
    %c0_9 = arith.constant 0 : index
    %c0_10 = arith.constant 0 : index
    %12 = vector.load %arg4[%c0_9, %c0_10] : memref<16x256xbf16, #tpu.memory_space<vmem>>, vector<16x256xbf16>
    %13 = arith.extf %12 : vector<16x256xbf16> to vector<16x256xf32>
    %cst_11 = arith.constant dense<0.000000e+00> : vector<64x256xf32>
    %14 = tpu.matmul %11, %13, %cst_11 {dimension_numbers = #tpu.dot_dimension_numbers<[1], [0], [0], [1], [0, 0, 1, 1], [], []>} : vector<64x16xf32>, vector<16x256xf32>, vector<64x256xf32> -> vector<64x256xf32>
    %15 = arith.addf %9, %14 : vector<64x256xf32>
    %c0_12 = arith.constant 0 : index
    %c0_13 = arith.constant 0 : index
    %16 = vector.load %arg7[%c0_12, %c0_13] : memref<64x1xbf16, #tpu.memory_space<vmem>>, vector<64x1xbf16>
    %17 = arith.extf %16 : vector<64x1xbf16> to vector<64x1xf32>
    %18 = vector.broadcast %17 : vector<64x1xf32> to vector<64x256xf32>
    %19 = arith.addf %15, %18 : vector<64x256xf32>
    %cst_14 = arith.constant 0.000000e+00 : f32
    %20 = vector.broadcast %cst_14 : f32 to vector<64x256xf32>
    %21 = arith.maximumf %19, %20 : vector<64x256xf32>
    %c0_15 = arith.constant 0 : index
    %c0_16 = arith.constant 0 : index
    %22 = vector.load %arg8[%c0_15, %c0_16] : memref<32x64xbf16, #tpu.memory_space<vmem>>, vector<32x64xbf16>
    %23 = arith.extf %22 : vector<32x64xbf16> to vector<32x64xf32>
    %cst_17 = arith.constant dense<0.000000e+00> : vector<32x256xf32>
    %24 = tpu.matmul %23, %21, %cst_17 {dimension_numbers = #tpu.dot_dimension_numbers<[1], [0], [0], [1], [0, 0, 1, 1], [], []>} : vector<32x64xf32>, vector<64x256xf32>, vector<32x256xf32> -> vector<32x256xf32>
    %c0_18 = arith.constant 0 : index
    %c0_19 = arith.constant 0 : index
    %25 = vector.load %arg9[%c0_18, %c0_19] : memref<32x1xbf16, #tpu.memory_space<vmem>>, vector<32x1xbf16>
    %26 = arith.extf %25 : vector<32x1xbf16> to vector<32x1xf32>
    %27 = vector.broadcast %26 : vector<32x1xf32> to vector<32x256xf32>
    %28 = arith.addf %24, %27 : vector<32x256xf32>
    %cst_20 = arith.constant 0.000000e+00 : f32
    %29 = vector.broadcast %cst_20 : f32 to vector<32x256xf32>
    %30 = arith.maximumf %28, %29 : vector<32x256xf32>
    %c0_21 = arith.constant 0 : index
    %c0_22 = arith.constant 0 : index
    %31 = vector.load %arg10[%c0_21, %c0_22] : memref<16x32xbf16, #tpu.memory_space<vmem>>, vector<16x32xbf16>
    %32 = arith.extf %31 : vector<16x32xbf16> to vector<16x32xf32>
    %cst_23 = arith.constant dense<0.000000e+00> : vector<16x256xf32>
    %33 = tpu.matmul %32, %30, %cst_23 {dimension_numbers = #tpu.dot_dimension_numbers<[1], [0], [0], [1], [0, 0, 1, 1], [], []>} : vector<16x32xf32>, vector<32x256xf32>, vector<16x256xf32> -> vector<16x256xf32>
    %c0_24 = arith.constant 0 : index
    %c0_25 = arith.constant 0 : index
    %34 = vector.load %arg11[%c0_24, %c0_25] : memref<16x1xbf16, #tpu.memory_space<vmem>>, vector<16x1xbf16>
    %35 = arith.extf %34 : vector<16x1xbf16> to vector<16x1xf32>
    %36 = vector.broadcast %35 : vector<16x1xf32> to vector<16x256xf32>
    %37 = arith.addf %33, %36 : vector<16x256xf32>
    %cst_26 = arith.constant 0.000000e+00 : f32
    %38 = vector.broadcast %cst_26 : f32 to vector<16x256xf32>
    %39 = arith.maximumf %37, %38 : vector<16x256xf32>
    %c0_27 = arith.constant 0 : index
    %c0_28 = arith.constant 0 : index
    %40 = vector.load %arg12[%c0_27, %c0_28] : memref<1x16xbf16, #tpu.memory_space<vmem>>, vector<1x16xbf16>
    %41 = arith.extf %40 : vector<1x16xbf16> to vector<1x16xf32>
    %cst_29 = arith.constant dense<0.000000e+00> : vector<1x256xf32>
    %42 = tpu.matmul %41, %4, %cst_29 {dimension_numbers = #tpu.dot_dimension_numbers<[1], [0], [0], [1], [0, 0, 1, 1], [], []>} : vector<1x16xf32>, vector<16x256xf32>, vector<1x256xf32> -> vector<1x256xf32>
    %c0_30 = arith.constant 0 : index
    %c0_31 = arith.constant 0 : index
    %43 = vector.load %arg13[%c0_30, %c0_31] : memref<1x16xbf16, #tpu.memory_space<vmem>>, vector<1x16xbf16>
    %44 = arith.extf %43 : vector<1x16xbf16> to vector<1x16xf32>
    %cst_32 = arith.constant dense<0.000000e+00> : vector<1x256xf32>
    %45 = tpu.matmul %44, %39, %cst_32 {dimension_numbers = #tpu.dot_dimension_numbers<[1], [0], [0], [1], [0, 0, 1, 1], [], []>} : vector<1x16xf32>, vector<16x256xf32>, vector<1x256xf32> -> vector<1x256xf32>
    %46 = arith.addf %42, %45 : vector<1x256xf32>
    %c0_33 = arith.constant 0 : index
    %c0_34 = arith.constant 0 : index
    %47 = vector.load %arg14[%c0_33, %c0_34] : memref<1x1xbf16, #tpu.memory_space<vmem>>, vector<1x1xbf16>
    %48 = arith.extf %47 : vector<1x1xbf16> to vector<1x1xf32>
    %49 = vector.broadcast %48 : vector<1x1xf32> to vector<1x256xf32>
    %50 = arith.addf %46, %49 : vector<1x256xf32>
    %c0_35 = arith.constant 0 : index
    %c0_36 = arith.constant 0 : index
    %51 = vector.load %arg15[%c0_35, %c0_36] : memref<1x256xf32, #tpu.memory_space<vmem>>, vector<1x256xf32>
    tpu.vector_store %arg15[%c0_35, %c0_36], %50 {strides = array<i32>} : memref<1x256xf32, #tpu.memory_space<vmem>>, vector<1x256xf32>,
    return
  }
  func.func @transform_0(%arg0: i32) -> (i32, i32) {
    %c0_i32 = arith.constant 0 : i32
    %c0_i32_0 = arith.constant 0 : i32
    return %c0_i32, %arg0 : i32, i32
  }
  func.func @transform_1(%arg0: i32) -> (i32, i32) {
    %c0_i32 = arith.constant 0 : i32
    %c0_i32_0 = arith.constant 0 : i32
    return %c0_i32, %arg0 : i32, i32
  }
  func.func @transform_2(%arg0: i32) -> (i32, i32) {
    %c0_i32 = arith.constant 0 : i32
    %c0_i32_0 = arith.constant 0 : i32
    return %c0_i32, %arg0 : i32, i32
  }
  func.func @transform_3(%arg0: i32) -> (i32, i32) {
    %c0_i32 = arith.constant 0 : i32
    %c0_i32_0 = arith.constant 0 : i32
    return %c0_i32, %arg0 : i32, i32
  }
  func.func @transform_4(%arg0: i32) -> (i32, i32) {
    %c0_i32 = arith.constant 0 : i32
    %c0_i32_0 = arith.constant 0 : i32
    %c0_i32_1 = arith.constant 0 : i32
    return %c0_i32, %c0_i32_0 : i32, i32
  }
  func.func @transform_5(%arg0: i32) -> (i32, i32) {
    %c0_i32 = arith.constant 0 : i32
    %c0_i32_0 = arith.constant 0 : i32
    %c0_i32_1 = arith.constant 0 : i32
    return %c0_i32, %c0_i32_0 : i32, i32
  }
  func.func @transform_6(%arg0: i32) -> (i32, i32) {
    %c0_i32 = arith.constant 0 : i32
    %c0_i32_0 = arith.constant 0 : i32
    %c0_i32_1 = arith.constant 0 : i32
    return %c0_i32, %c0_i32_0 : i32, i32
  }
  func.func @transform_7(%arg0: i32) -> (i32, i32) {
    %c0_i32 = arith.constant 0 : i32
    %c0_i32_0 = arith.constant 0 : i32
    %c0_i32_1 = arith.constant 0 : i32
    return %c0_i32, %c0_i32_0 : i32, i32
  }
  func.func @transform_8(%arg0: i32) -> (i32, i32) {
    %c0_i32 = arith.constant 0 : i32
    %c0_i32_0 = arith.constant 0 : i32
    %c0_i32_1 = arith.constant 0 : i32
    return %c0_i32, %c0_i32_0 : i32, i32
  }
  func.func @transform_9(%arg0: i32) -> (i32, i32) {
    %c0_i32 = arith.constant 0 : i32
    %c0_i32_0 = arith.constant 0 : i32
    %c0_i32_1 = arith.constant 0 : i32
    return %c0_i32, %c0_i32_0 : i32, i32
  }
  func.func @transform_10(%arg0: i32) -> (i32, i32) {
    %c0_i32 = arith.constant 0 : i32
    %c0_i32_0 = arith.constant 0 : i32
    %c0_i32_1 = arith.constant 0 : i32
    return %c0_i32, %c0_i32_0 : i32, i32
  }
  func.func @transform_11(%arg0: i32) -> (i32, i32) {
    %c0_i32 = arith.constant 0 : i32
    %c0_i32_0 = arith.constant 0 : i32
    %c0_i32_1 = arith.constant 0 : i32
    return %c0_i32, %c0_i32_0 : i32, i32
  }
  func.func @transform_12(%arg0: i32) -> (i32, i32) {
    %c0_i32 = arith.constant 0 : i32
    %c0_i32_0 = arith.constant 0 : i32
    %c0_i32_1 = arith.constant 0 : i32
    return %c0_i32, %c0_i32_0 : i32, i32
  }
  func.func @transform_13(%arg0: i32) -> (i32, i32) {
    %c0_i32 = arith.constant 0 : i32
    %c0_i32_0 = arith.constant 0 : i32
    %c0_i32_1 = arith.constant 0 : i32
    return %c0_i32, %c0_i32_0 : i32, i32
  }
  func.func @transform_14(%arg0: i32) -> (i32, i32) {
    %c0_i32 = arith.constant 0 : i32
    %c0_i32_0 = arith.constant 0 : i32
    return %c0_i32, %arg0 : i32, i32
  }
}

</mosaic_0001>

<bundles_post_ra>
// kernel: tpu_custom_call.1
= control target key start
LH: loop header
LB: loop body
LE: loop exit
PB: predicated region body
PF: predicated region fallthrough
CT: control target
= control target key end

     0   :  { %s2384_s0 = inlined_call_operand.vmem [shape: bf16[16,512], index: 0, kind: input, shape index: {}]   ;;  %s2385_s1 = inlined_call_operand.vmem [shape: bf16[16,512], index: 1, kind: input, shape index: {}]   ;;  %s2386_s2 = inlined_call_operand.vmem [shape: bf16[16,512], index: 2, kind: input, shape index: {}]   ;;  %s2387_s3 = inlined_call_operand.vmem [shape: bf16[16,512], index: 3, kind: input, shape index: {}]   ;;  %s2388_s4 = inlined_call_operand.vmem [shape: bf16[64,16], index: 4, kind: input, shape index: {}]   ;;  %s2389_s5 = inlined_call_operand.vmem [shape: bf16[64,16], index: 5, kind: input, shape index: {}]   ;;  %s2390_s6 = inlined_call_operand.vmem [shape: bf16[64,1], index: 6, kind: input, shape index: {}]   ;;  %s2391_s7 = inlined_call_operand.vmem [shape: bf16[32,64], index: 7, kind: input, shape index: {}]   ;;  %s2392_s8 = inlined_call_operand.vmem [shape: bf16[32,1], index: 8, kind: input, shape index: {}]   ;;  %s2393_s9 = inlined_call_operand.vmem [shape: bf16[16,32], index: 9, kind: input, shape index: {}]   ;;  %s2394_s10 = inlined_call_operand.vmem [shape: bf16[16,1], index: 10, kind: input, shape index: {}]   ;;  %s2395_s11 = inlined_call_operand.vmem [shape: bf16[1,16], index: 11, kind: input, shape index: {}]   ;;  %s2396_s12 = inlined_call_operand.vmem [shape: bf16[1,16], index: 12, kind: input, shape index: {}]   ;;  %s2397_s13 = inlined_call_operand.<no memory space> [shape: bf16[1,1], index: 13, kind: input, shape index: {}]   ;;  %s2398_s14 = inlined_call_operand.hbm [shape: f32[1,512], index: 14, kind: output, shape index: {}]  }
   0x1   :  { %v19_v0 = vstv %s2397_s13 }
   0x2   :  { %20 = vst [vmem:[#allocation2] sm:$0x1] %v19_v0 }
   0x3   :  { %21 = vsyncpa [#allocation8], 0 }
   0x4   :  { %23 = vsyncpa [#allocation8 + $0x1], 0  ;;  %s2130_s15 = smov 0   ;;  %s2132_s16 = smov 0  }
   0x5   :  { %s2134_s17 = smov 0   ;;  %s2136_s18 = smov 0  }
   0x6 LB: > { %2404 = sst [smem:[#allocation10_spill]] %s2033_s15  ;;  %s2399_s13 = sadd.s32 4294967295, %s2045_s18   ;;  %s2045_s18 = sphi %s2136_s18, %s2414_s18   ;;  %s2041_s17 = sphi %s2134_s17, %s2418_s17   ;;  %s2037_s16 = sphi %s2132_s16, %s2417_s16   ;;  %s2033_s15 = sphi %s2130_s15, %s2416_s15  }
   0x7   : > { %s1695_s19 = sadd.s32 4294967294, %s2045_s18   ;;  %s2153_s20 = sadd.s32 1, %s2045_s18  }
   0x8   : > { %2405 = sst [smem:[#allocation11_spill]] %s2153_s20  ;;  %s36_s21 = sadd.s32 1, %s2041_s17 }
   0x9   : > { %s33_s22 = ssub.s32 %s2045_s18, %s2153_s20  ;;  %p43_p0 = scmp.ne.s32.totalorder %s2041_s17, %s2037_s16 }
   0xa   : > { %p34_p1 = scmp.eq.s32.totalorder %s33_s22, 0  ;;  %p44_p2 = scmp.eq.s32.totalorder %s2045_s18, 0 }
   0xb   : > { %p361_p3 = scmp.eq.s32.totalorder %s2399_s13, 1  ;;  %p366_p4 = scmp.ne.s32.totalorder %s2037_s16, %s2033_s15 }
   0xc   : > { %s2166_s23 = scalar_select %p34_p1, %s2041_s17, %s36_s21  }
   0xd   : > { %p2168_p5 = por %p44_p2, %p43_p0  ;;  %p2172_p6 = por %p361_p3, %p43_p0 }
   0xe   : > { %2406 = sst [smem:[#allocation12_spill]] %s2166_s23  ;;  %p367_p7 = scmp.eq.s32.totalorder %s1695_s19, 1 }
   0xf   : > { %p1697_p9 = scmp.ge.s32.totalorder %s2045_s18, 2 }
  0x10   : > { %p2176_p8 = por %p367_p7, %p366_p4 }
  0x11   : > { %413 = sbr.rel (%p1697_p9) target bundleno = 52 (0x34), region = 56 }
  0x12   : > { %s2409_s26 = scalar_select %p2176_p8, 1, 0 }
  0x14   : > { %2410 = sst [smem:[#allocation13_spill]] %s2409_s26 }
  0x18   : > { %416 = sbr.rel (!%p2168_p5) target bundleno = 31 (0x1f), region = 60  ;;  %s418_s27 = sand.u32 (%p2168_p5), 1, %s2041_s17  }
  0x19   : > { %s1745_s28 = sshll.u32 (%p2168_p5), %s2045_s18, 3  ;;  %s1698_s29 = sshll.u32 (%p2168_p5), %s418_s27, 4 }
  0x1a   : > { %s423_s19 = scalar_lea.vmem (%p2168_p5), %s2384_s0, %s1745_s28  ;;  %s420_s22 = scalar_lea.vmem (%p2168_p5), [#allocation3], %s1698_s29 }
  0x1b   : > { %v453_v1 = vld [vmem:[%s423_s19] sm:$0xff] (%p2168_p5)  ;;  %v455_v2 = vld [vmem:[%s423_s19 + $0x10] sm:$0xff] (%p2168_p5) }
  0x1c   : > { %454 = vst [vmem:[%s420_s22] sm:$0xff] (%p2168_p5), %v453_v1  ;;  %456 = vst [vmem:[%s420_s22 + $0x8] sm:$0xff] (%p2168_p5), %v455_v2 }
  0x1f PF: > { %462 = sbr.rel (!%p2168_p5) target bundleno = 38 (0x26), region = 98  ;;  %s464_s13 = sand.u32 (%p2168_p5), 1, %s2041_s17  }
  0x20   : > { %s1746_s23 = sshll.u32 (%p2168_p5), %s2045_s18, 3  ;;  %s1701_s20 = sshll.u32 (%p2168_p5), %s464_s13, 4 }
  0x21   : > { %s469_s15 = scalar_lea.vmem (%p2168_p5), %s2385_s1, %s1746_s23  ;;  %s466_s28 = scalar_lea.vmem (%p2168_p5), [#allocation4], %s1701_s20 }
  0x22   : > { %v499_v3 = vld [vmem:[%s469_s15] sm:$0xff] (%p2168_p5)  ;;  %v501_v4 = vld [vmem:[%s469_s15 + $0x10] sm:$0xff] (%p2168_p5) }
  0x23   : > { %500 = vst [vmem:[%s466_s28] sm:$0xff] (%p2168_p5), %v499_v3  ;;  %502 = vst [vmem:[%s466_s28 + $0x8] sm:$0xff] (%p2168_p5), %v501_v4 }
  0x26 PF: > { %508 = sbr.rel (!%p2168_p5) target bundleno = 45 (0x2d), region = 136  ;;  %s510_s29 = sand.u32 (%p2168_p5), 1, %s2041_s17  }
  0x27   : > { %s1747_s30 = sshll.u32 (%p2168_p5), %s2045_s18, 3  ;;  %s1704_s21 = sshll.u32 (%p2168_p5), %s510_s29, 4 }
  0x28   : > { %s515_s22 = scalar_lea.vmem (%p2168_p5), %s2386_s2, %s1747_s30  ;;  %s512_s23 = scalar_lea.vmem (%p2168_p5), [#allocation5], %s1704_s21 }
  0x29   : > { %v545_v5 = vld [vmem:[%s515_s22] sm:$0xff] (%p2168_p5)  ;;  %v547_v6 = vld [vmem:[%s515_s22 + $0x10] sm:$0xff] (%p2168_p5) }
  0x2a   : > { %546 = vst [vmem:[%s512_s23] sm:$0xff] (%p2168_p5), %v545_v5  ;;  %548 = vst [vmem:[%s512_s23 + $0x8] sm:$0xff] (%p2168_p5), %v547_v6 }
  0x2d PF: > { %554 = sbr.rel (!%p2168_p5) target bundleno = 52 (0x34), region = 174  ;;  %s556_s15 = sand.u32 (%p2168_p5), 1, %s2041_s17  }
  0x2e   : > { %s1748_s20 = sshll.u32 (%p2168_p5), %s2045_s18, 3  ;;  %s1707_s26 = sshll.u32 (%p2168_p5), %s556_s15, 4 }
  0x2f   : > { %s561_s29 = scalar_lea.vmem (%p2168_p5), %s2387_s3, %s1748_s20  ;;  %s558_s30 = scalar_lea.vmem (%p2168_p5), [#allocation6], %s1707_s26 }
  0x30   : > { %v591_v7 = vld [vmem:[%s561_s29] sm:$0xff] (%p2168_p5)  ;;  %v593_v8 = vld [vmem:[%s561_s29 + $0x10] sm:$0xff] (%p2168_p5) }
  0x31   : > { %592 = vst [vmem:[%s558_s30] sm:$0xff] (%p2168_p5), %v591_v7  ;;  %594 = vst [vmem:[%s558_s30 + $0x8] sm:$0xff] (%p2168_p5), %v593_v8 }
  0x34 PF: > { %p1710_p10 = scmp.ge.s32.totalorder %s2045_s18, 1  ;;  %p599_p11 = scmp.lt.s32.totalorder %s2045_s18, 3 }
  0x36   : > { %p600_p12 = pnand %p1710_p10, %p599_p11 }
  0x37   : > { %s2214_s24 = sand.u32 (!%p600_p12), 1, %s2037_s16   ;;  %v2047_v9 = vmov (!%p600_p12), 0.0   ;;  %v1767_v10 = vld [vmem:[%s2389_s5] sm:$0xff] (!%p600_p12)   ;;  %v1826_v11 = vld [vmem:[%s2389_s5 + $0x10] sm:$0xff] (!%p600_p12)   ;;  %v1828_v20 = vld [vmem:[%s2390_s6 + $0x8] sm:$0xff] (!%p600_p12)   ;;  %vm749_vm0 = vcmask (!%p600_p12), 130048  }
  0x38   : > { %603 = sbr.rel (%p600_p12) target bundleno = 1037 (0x40d), region = 212  ;;  %s2217_s21 = sshll.u32 (!%p600_p12), %s2214_s24, 4  ;;  %838 = vmatprep.mubr.f32.mxu0 (!%p600_p12), %v2047_v9  ;;  %862 = vmatprep.mubr.f32.mxu1 (!%p600_p12), %v2047_v9  ;;  %v1783_v12 = vld [vmem:[%s2390_s6] sm:$0xff] (!%p600_p12)   ;;  %v1768_v15 = vunpack.c.l.bf16 (!%p600_p12), %v1767_v10  ;;  %v1776_v17 = vunpack.c.l.bf16 (!%p600_p12), %v1826_v11  ;;  %v1788_v22 = vunpack.c.l.bf16 (!%p600_p12), %v1828_v20  ;;  %v1829_v23 = vld [vmem:[%s2390_s6 + $0x10] sm:$0xff] (!%p600_p12)   ;;  %v1830_v24 = vld [vmem:[%s2390_s6 + $0x18] sm:$0xff] (!%p600_p12)   ;;  %v2048_v25 = vmov (!%p600_p12), 0  }
  0x39   : > { %s629_s26 = scalar_lea.vmem (!%p600_p12), [#allocation6], %s2217_s21  ;;  %s622_s27 = scalar_lea.vmem (!%p600_p12), [#allocation5], %s2217_s21  ;;  %v1784_v18 = vunpack.c.l.bf16 (!%p600_p12), %v1783_v12  ;;  %v1785_v19 = vunpack.c.h.bf16 (!%p600_p12), %v1783_v12  ;;  %1940 = vset.pattern.permute.xlu0 (!%p600_p12), %v2048_v25  ;;  %v1789_v27 = vunpack.c.h.bf16 (!%p600_p12), %v1828_v20  ;;  %v1792_v28 = vunpack.c.l.bf16 (!%p600_p12), %v1829_v23  ;;  %1951 = vset.pattern.permute.xlu1 (!%p600_p12), %v2048_v25  ;;  %v1807_v30 = vld [vmem:[%s2392_s8] sm:$0xff] (!%p600_p12)   ;;  %v1832_v36 = vld [vmem:[%s2392_s8 + $0x8] sm:$0xff] (!%p600_p12)   ;;  %v1827_v38 = vld [vmem:[%s2389_s5 + $0x18] sm:$0xff] (!%p600_p12)  }
  0x3a   : > { %v1977_v13 = vld [vmem:[%s629_s26 + $0x4] ss:$8 sps:$4 sm:$0xff] (!%p600_p12)   ;;  %v1979_v14 = vld [vmem:[%s629_s26] ss:$8 sps:$4 sm:$0xff] (!%p600_p12)   ;;  %v1793_v29 = vunpack.c.h.bf16 (!%p600_p12), %v1829_v23  ;;  %v1796_v31 = vunpack.c.l.bf16 (!%p600_p12), %v1830_v24  ;;  %v1797_v32 = vunpack.c.h.bf16 (!%p600_p12), %v1830_v24  ;;  %v1769_v33 = vunpack.c.h.bf16 (!%p600_p12), %v1767_v10  ;;  %s608_s20 = scalar_lea.vmem (!%p600_p12), [#allocation3], %s2217_s21  ;;  %s615_s26 = scalar_lea.vmem (!%p600_p12), [#allocation4], %s2217_s21 }
  0x3b   : > { %1834 = vmatprep.subr.bf16.mxu0 (!%p600_p12), %v1977_v13  ;;  %v1980_v16 = vld [vmem:[%s622_s27 + $0x4] ss:$8 sps:$4 sm:$0xff] (!%p600_p12)   ;;  %1873 = vmatprep.subr.bf16.mxu1 (!%p600_p12), %v1977_v13  ;;  %v1982_v21 = vld [vmem:[%s622_s27] ss:$8 sps:$4 sm:$0xff] (!%p600_p12)   ;;  %v1941_v26 = vpack.i.bf16 (!%p600_p12), %v1785_v19, %v1784_v18  ;;  %v1777_v34 = vunpack.c.h.bf16 (!%p600_p12), %v1826_v11  ;;  %v1946_v39 = vpack.i.bf16 (!%p600_p12), %v1789_v27, %v1788_v22  ;;  %v1808_v40 = vunpack.c.l.bf16 (!%p600_p12), %v1807_v30  ;;  %s1715_s30 = sshll.u32 (!%p600_p12), %s2214_s24, 1  ;;  %s2411_s19 = sadd.s32 (!%p600_p12), 4294967295, %s2045_s18  }
  0x3c   : > { %1836 = vmatpush1.bf16.msra.mxu0 (!%p600_p12), %v1979_v14  ;;  %1874 = vmatpush1.bf16.msra.mxu1 (!%p600_p12), %v1979_v14  ;;  %v1952_v35 = vpack.i.bf16 (!%p600_p12), %v1793_v29, %v1792_v28  ;;  %v1825_v37 = vld [vmem:[%s2389_s5 + $0x8] sm:$0xff] (!%p600_p12)   ;;  %v1809_v41 = vunpack.c.h.bf16 (!%p600_p12), %v1807_v30  ;;  %v1957_v42 = vpack.i.bf16 (!%p600_p12), %v1797_v32, %v1796_v31  ;;  %v1819_v43 = vld [vmem:[%s2394_s10] sm:$0xff] (!%p600_p12)   ;;  %v1812_v44 = vunpack.c.l.bf16 (!%p600_p12), %v1832_v36  ;;  %v1823_v63 = vld [vmem:[%s2388_s4 + $0x10] sm:$0xff] (!%p600_p12)   ;;  %s1749_s13 = sshll.u32 (!%p600_p12), %s2411_s19, 5  ;;  %s683_s22 = scalar_lea.vmem (!%p600_p12), [#allocation7], %s1715_s30 }
  0x3d   : > { %1838 = vmatprep.subr.bf16.mxu0 (!%p600_p12), %v1980_v16  ;;  %1942 = vperm.xlu0 (!%p600_p12), %1940, %v1941_v26   ;;  %v1813_v45 = vunpack.c.h.bf16 (!%p600_p12), %v1832_v36  ;;  %v1772_v46 = vunpack.c.l.bf16 (!%p600_p12), %v1825_v37  ;;  %v1780_v47 = vunpack.c.l.bf16 (!%p600_p12), %v1827_v38  ;;  %v1820_v49 = vunpack.c.l.bf16 (!%p600_p12), %v1819_v43  ;;  %v1516_v54 = vld [vmem:[#allocation2] sm:$0x1] (!%p600_p12)  ;;  %v1822_v60 = vld [vmem:[%s2388_s4 + $0x8] sm:$0xff] (!%p600_p12)   ;;  %v1824_v2 = vld [vmem:[%s2388_s4 + $0x18] sm:$0xff] (!%p600_p12)   ;;  %s1576_s23 = sshll.u32 (!%p600_p12), %s683_s22, 4  ;;  %s1562_s21 = scalar_lea.sflag (!%p600_p12), [#allocation8], %s2214_s24  ;;  %s2342_s23 = int_to_ptr.vmem [resolvable:$true] %s1576_s23 }
  0x3e   : > { %1953 = vperm.xlu1 (!%p600_p12), %1951, %v1952_v35   ;;  %v1962_v48 = vpack.i.bf16 (!%p600_p12), %v1809_v41, %v1808_v40  ;;  %v1821_v50 = vunpack.c.h.bf16 (!%p600_p12), %v1819_v43  ;;  %v1773_v52 = vunpack.c.h.bf16 (!%p600_p12), %v1825_v37  ;;  %v1781_v53 = vunpack.c.h.bf16 (!%p600_p12), %v1827_v38  ;;  %v1751_v55 = vld [vmem:[%s2388_s4] sm:$0xff] (!%p600_p12)   ;;  %s1983_s27 = scalar_lea.vmem (!%p600_p12), %s2342_s23, 32  ;;  %s2051_s28 = smov (!%p600_p12), [#allocation7]  }
  0x3f   : > { %1716 = vmatmul.mubr.msk.f32.vlgmr.msra.gmra.mrb[0].mxu0 %vm749_vm0, %v1768_v15  ;;  %1720 = vmatmul.mubr.msk.f32.vlgmr.msra.gmra.mrb[0].mxu1 %vm749_vm0, %v1776_v17  ;;  %v1967_v51 = vpack.i.bf16 %v1813_v45, %v1812_v44  ;;  %v1517_v57 = vunpack.c.l.bf16 %v1516_v54  ;;  %v1752_v58 = vunpack.c.l.bf16 %v1751_v55  ;;  %v1753_v59 = vunpack.c.h.bf16 %v1751_v55  ;;  %p1984_p13 = scmp.ne.s32.totalorder %s2342_s23, %s1983_s27  ;;  %s1987_s29 = sshll.u32 %s2051_s28, 4  ;;  %s1988_s29 = int_to_ptr.vmem [resolvable:$false] %s1987_s29 }
  0x40   : > { %844 = vmatprep.mubr.f32.mxu0 %v2047_v9  ;;  %1840 = vmatpush1.bf16.msra.mxu0 %v1982_v21  ;;  %v1972_v56 = vpack.i.bf16 %v1821_v50, %v1820_v49  ;;  %v1756_v61 = vunpack.c.l.bf16 %v1822_v60  ;;  %v1757_v62 = vunpack.c.h.bf16 %v1822_v60  ;;  %v1760_v0 = vunpack.c.l.bf16 %v1823_v63  ;;  %s1989_s30 = scalar_lea.vmem %s1988_s29, 64  ;;  %p1990_p2 = scmp.lt.s32.totalorder %s2342_s23, %s1988_s29 }
  0x41   : > { %868 = vmatprep.mubr.f32.mxu1 %v2047_v9  ;;  %1947 = vperm.xlu0 %1940, %v1946_v39   ;;  %v1761_v1 = vunpack.c.h.bf16 %v1823_v63  ;;  %v1764_v3 = vunpack.c.l.bf16 %v1824_v2  ;;  %v1765_v4 = vunpack.c.h.bf16 %v1824_v2  ;;  %vm1148_vm1 = vcmask 523264   ;;  %p1985_p0 = pnand %p1984_p13, %p2172_p6  ;;  %p1991_p3 = scmp.lt.s32.totalorder %s1989_s30, %s1983_s27 }
  0x42   : > { %1958 = vperm.xlu1 %1951, %v1957_v42   ;;  %vm1276_vm2 = vcmask 261120  }
  0x43   : > { %1717 = vmatmul.mubr.msk.f32.gmra.mrb[2].mxu0 %vm749_vm0, %v1769_v33  ;;  %1721 = vmatmul.mubr.msk.f32.gmra.mrb[2].mxu1 %vm749_vm0, %v1777_v34  ;;  %p1986_p1 = pneg %p1985_p0  ;;  %p1992_p4 = por %p1991_p3, %p1990_p2 }
  0x44   : > { %850 = vmatprep.mubr.f32.mxu0 %v2047_v9  ;;  %874 = vmatprep.mubr.f32.mxu1 %v2047_v9 }
  0x45   : > { %1963 = vperm.xlu0 %1940, %v1962_v48   ;;  %p1993_p5 = pnand %p1992_p4, %p1986_p1 }
  0x46   : > { %1968 = vperm.xlu1 %1951, %v1967_v51  }
  0x47   : > { %1718 = vmatmul.mubr.msk.f32.gmra.mrb[4].mxu0 %vm749_vm0, %v1772_v46  ;;  %1722 = vmatmul.mubr.msk.f32.gmra.mrb[4].mxu1 %vm749_vm0, %v1780_v47 }
  0x48   : > { %856 = vmatprep.mubr.f32.mxu0 %v2047_v9  ;;  %880 = vmatprep.mubr.f32.mxu1 %v2047_v9 }
  0x49   : > { %1973 = vperm.xlu0 %1940, %v1972_v56  }
  0x4a   : > { %1520 = vperm.xlu1 %1951, %v1517_v57  }
  0x4b   : > { %1719 = vmatmul.mubr.msk.f32.gmra.mrb[6].mxu0 %vm749_vm0, %v1773_v52  ;;  %1723 = vmatmul.mubr.msk.f32.gmra.mrb[6].mxu1 %vm749_vm0, %v1781_v53 }
  0x4c   : > { %975 = vmatprep.mubr.f32.mxu0 %v2047_v9  ;;  %1225 = vmatprep.mubr.f32.mxu1 %v2047_v9 }
  0x4f   : > { %1724 = vmatmul.mubr.msk.f32.vlgmr.msra.gmra.mrb[0].mxu0 %vm749_vm0, %v1752_v58 }
  0x50   : > { %981 = vmatprep.mubr.f32.mxu0 %v2047_v9 }
  0x53   : > { %1725 = vmatmul.mubr.msk.f32.gmra.mrb[2].mxu0 %vm749_vm0, %v1753_v59 }
  0x54   : > { %987 = vmatprep.mubr.f32.mxu0 %v2047_v9 }
  0x57   : > { %1726 = vmatmul.mubr.msk.f32.gmra.mrb[4].mxu0 %vm749_vm0, %v1756_v61 }
  0x58   : > { %993 = vmatprep.mubr.f32.mxu0 %v2047_v9 }
  0x5b   : > { %1727 = vmatmul.mubr.msk.f32.gmra.mrb[6].mxu0 %vm749_vm0, %v1757_v62 }
  0x5c   : > { %999 = vmatprep.mubr.f32.mxu0 %v2047_v9 }
  0x5f   : > { %1728 = vmatmul.mubr.msk.f32.gmra.mrb[8].mxu0 %vm749_vm0, %v1760_v0 }
  0x60   : > { %1005 = vmatprep.mubr.f32.mxu0 %v2047_v9 }
  0x63   : > { %1729 = vmatmul.mubr.msk.f32.gmra.mrb[10].mxu0 %vm749_vm0, %v1761_v1 }
  0x64   : > { %1011 = vmatprep.mubr.f32.mxu0 %v2047_v9 }
  0x67   : > { %1730 = vmatmul.mubr.msk.f32.gmra.mrb[12].mxu0 %vm749_vm0, %v1764_v3 }
  0x68   : > { %1017 = vmatprep.mubr.f32.mxu0 %v2047_v9 }
  0x6b   : > { %1731 = vmatmul.mubr.msk.f32.gmra.mrb[14].mxu0 %vm749_vm0, %v1765_v4 }
  0xbc   : > { %v1943_v12 = vpop.permute.xlu0 %1942 }
  0xbd   : > { %v1944_v15 = vunpack.i.l.bf16 %v1943_v12  ;;  %v1945_v17 = vunpack.i.h.bf16 %v1943_v12  ;;  %v1954_v45 = vpop.permute.xlu1 %1953 }
  0xbe   : > { %v1955_v49 = vunpack.i.l.bf16 %v1954_v45  ;;  %v1956_v54 = vunpack.i.h.bf16 %v1954_v45 }
  0xc0   : > { %v1948_v22 = vpop.permute.xlu0 %1947 }
  0xc1   : > { %v1949_v28 = vunpack.i.l.bf16 %v1948_v22  ;;  %v1950_v33 = vunpack.i.h.bf16 %v1948_v22  ;;  %v1959_v62 = vpop.permute.xlu1 %1958 }
  0xc2   : > { %v1960_v2 = vunpack.i.l.bf16 %v1959_v62 }
 0x112   : > { %v864_v5 = vpop.f32.mrb[0].mxu1 }
 0x113   : > { %v866_v6 = vpop.f32.mrb[1].mxu1 }
 0x116   : > { %v870_v7 = vpop.f32.mrb[2].mxu1 }
 0x117   : > { %v872_v8 = vpop.f32.mrb[3].mxu1 }
 0x11a   : > { %v876_v10 = vpop.f32.mrb[4].mxu1 }
 0x11b   : > { %v2299_v11 = vpop.f32.mrb[5].mxu1 }
 0x11e   : > { %v2301_v13 = vpop.f32.mrb[6].mxu1 }
 0x11f   : > { %v2303_v14 = vpop.f32.mrb[7].mxu1 }
 0x122   : > { %v977_v16 = vpop.f32.mrb[0].mxu0 }
 0x123   : > { %v979_v18 = vpop.f32.mrb[1].mxu0  ;;  %v1080_v19 = vadd.f32 %v1944_v15, %v977_v16 }
 0x124   : > { %v1081_v20 = vadd.f32 %v1944_v15, %v979_v18  ;;  %v1961_v18 = vunpack.i.h.bf16 %v1959_v62 }
 0x125   : > { %v1096_v26 = vmax.f32 %v1080_v19, 0.0 }
 0x126   : > { %v983_v21 = vpop.f32.mrb[2].mxu0  ;;  %v1097_v29 = vmax.f32 %v1081_v20, 0.0 }
 0x127   : > { %v1082_v23 = vadd.f32 %v1945_v17, %v983_v21  ;;  %v985_v24 = vpop.f32.mrb[3].mxu0 }
 0x128   : > { %v1083_v25 = vadd.f32 %v1945_v17, %v985_v24 }
 0x129   : > { %v1098_v27 = vmax.f32 %v1082_v23, 0.0 }
 0x12a   : > { %v1099_v30 = vmax.f32 %v1083_v25, 0.0  ;;  %v989_v31 = vpop.f32.mrb[4].mxu0 }
 0x12b   : > { %v1843_v32 = vpack.c.bf16 %v1098_v27, %v1096_v26  ;;  %v991_v34 = vpop.f32.mrb[5].mxu0  ;;  %v1084_v36 = vadd.f32 %v1949_v28, %v989_v31 }
 0x12c   : > { %v1841_v35 = vpack.c.bf16 %v1099_v30, %v1097_v29  ;;  %v1085_v37 = vadd.f32 %v1949_v28, %v991_v34  ;;  %v1799_v28 = vld [vmem:[%s2391_s7] sm:$0xff]   ;;  %v1831_v30 = vld [vmem:[%s2391_s7 + $0x8] sm:$0xff]  }
 0x12d   : > { %v1100_v42 = vmax.f32 %v1084_v36, 0.0  ;;  %v1804_v31 = vunpack.c.l.bf16 %v1831_v30 }
 0x12e   : > { %v995_v38 = vpop.f32.mrb[6].mxu0  ;;  %1842 = vmatprep.subr.bf16.mxu1 %v1841_v35  ;;  %v1101_v44 = vmax.f32 %v1085_v37, 0.0 }
 0x12f   : > { %v1086_v39 = vadd.f32 %v1950_v33, %v995_v38  ;;  %v997_v40 = vpop.f32.mrb[7].mxu0  ;;  %1844 = vmatpush1.bf16.msra.mxu1 %v1843_v32  ;;  %v1805_v32 = vunpack.c.h.bf16 %v1831_v30 }
 0x130   : > { %v1087_v41 = vadd.f32 %v1950_v33, %v997_v40  ;;  %v1964_v33 = vpop.permute.xlu0 %1963 }
 0x131   : > { %v1102_v43 = vmax.f32 %v1086_v39, 0.0  ;;  %v1965_v35 = vunpack.i.l.bf16 %v1964_v33  ;;  %v1966_v37 = vunpack.i.h.bf16 %v1964_v33 }
 0x132   : > { %v1103_v46 = vmax.f32 %v1087_v41, 0.0  ;;  %v1001_v47 = vpop.f32.mrb[8].mxu0 }
 0x133   : > { %v1847_v48 = vpack.c.bf16 %v1102_v43, %v1100_v42  ;;  %v1002_v50 = vadd.f32 %v1001_v47, %v864_v5  ;;  %v1003_v51 = vpop.f32.mrb[9].mxu0 }
 0x134   : > { %v1845_v52 = vpack.c.bf16 %v1103_v46, %v1101_v44  ;;  %v1004_v53 = vadd.f32 %v1003_v51, %v866_v6  ;;  %v1969_v46 = vpop.permute.xlu1 %1968 }
 0x135   : > { %v1088_v56 = vadd.f32 %v1955_v49, %v1002_v50  ;;  %v1970_v50 = vunpack.i.l.bf16 %v1969_v46 }
 0x136   : > { %v1007_v55 = vpop.f32.mrb[10].mxu0  ;;  %1846 = vmatprep.subr.bf16.mxu1 %v1845_v52  ;;  %v1089_v59 = vadd.f32 %v1955_v49, %v1004_v53 }
 0x137   : > { %v1008_v57 = vadd.f32 %v1007_v55, %v870_v7  ;;  %v1009_v58 = vpop.f32.mrb[11].mxu0  ;;  %1848 = vmatpush1.bf16.msra.mxu1 %v1847_v48  ;;  %v1104_v1 = vmax.f32 %v1088_v56, 0.0 }
 0x138   : > { %v1010_v60 = vadd.f32 %v1009_v58, %v872_v8  ;;  %v1105_v12 = vmax.f32 %v1089_v59, 0.0 }
 0x139   : > { %v1090_v61 = vadd.f32 %v1956_v54, %v1008_v57 }
 0x13a   : > { %v1091_v63 = vadd.f32 %v1956_v54, %v1010_v60  ;;  %v1013_v0 = vpop.f32.mrb[12].mxu0  ;;  %v1971_v54 = vunpack.i.h.bf16 %v1969_v46  ;;  %v2049_v46 = vmov 269488144  }
 0x13b   : > { %v1106_v3 = vmax.f32 %v1090_v61, 0.0  ;;  %v1014_v4 = vadd.f32 %v1013_v0, %v876_v10  ;;  %v1015_v5 = vpop.f32.mrb[13].mxu0 }
 0x13c   : > { %v1107_v6 = vmax.f32 %v1091_v63, 0.0  ;;  %v1016_v15 = vadd.f32 %v1015_v5, %v2299_v11 }
 0x13d   : > { %v1851_v16 = vpack.c.bf16 %v1106_v3, %v1104_v1  ;;  %v1092_v19 = vadd.f32 %v1960_v2, %v1014_v4 }
 0x13e   : > { %v1019_v17 = vpop.f32.mrb[14].mxu0  ;;  %v1849_v7 = vpack.c.bf16 %v1107_v6, %v1105_v12  ;;  %v1093_v21 = vadd.f32 %v1960_v2, %v1016_v15  ;;  %v1815_v2 = vld [vmem:[%s2393_s9] sm:$0xff]   ;;  %v1974_v12 = vpop.permute.xlu0 %1973 }
 0x13f   : > { %v1020_v8 = vadd.f32 %v1019_v17, %v2301_v13  ;;  %v1021_v20 = vpop.f32.mrb[15].mxu0  ;;  %v1108_v24 = vmax.f32 %v1092_v19, 0.0  ;;  %v1800_v13 = vunpack.c.l.bf16 %v1799_v28  ;;  %v1816_v4 = vunpack.c.l.bf16 %v1815_v2  ;;  %v689_v6 = vld [vmem:[%s608_s20] sm:$0xff]  ;;  %v690_v15 = vld [vmem:[%s608_s20 + $0x8] sm:$0xff] }
 0x140   : > { %v1022_v22 = vadd.f32 %v1021_v20, %v2303_v14  ;;  %1850 = vmatprep.subr.bf16.mxu1 %v1849_v7  ;;  %v1109_v26 = vmax.f32 %v1093_v21, 0.0  ;;  %v1801_v14 = vunpack.c.h.bf16 %v1799_v28  ;;  %v1817_v5 = vunpack.c.h.bf16 %v1815_v2  ;;  %v696_v17 = vld [vmem:[%s615_s26 + $0x8] sm:$0xff] }
 0x141   : > { %v1094_v23 = vadd.f32 %v1961_v18, %v1020_v8  ;;  %1852 = vmatpush1.bf16.msra.mxu1 %v1851_v16  ;;  %v695_v16 = vld [vmem:[%s615_s26] sm:$0xff]  ;;  %v692_v8 = vunpack.c.h.bf16 %v689_v6  ;;  %v694_v20 = vunpack.c.h.bf16 %v690_v15  ;;  %v693_v28 = vunpack.c.l.bf16 %v690_v15  ;;  %s2340_s26 = scalar_lea.hbm %s2398_s14, %s1749_s13 }
 0x142   : > { %v1095_v10 = vadd.f32 %v1961_v18, %v1022_v22  ;;  %v1975_v18 = vunpack.i.l.bf16 %v1974_v12  ;;  %v698_v21 = vunpack.c.h.bf16 %v695_v16  ;;  %v700_v22 = vunpack.c.h.bf16 %v696_v17 }
 0x143   : > { %v1110_v25 = vmax.f32 %v1094_v23, 0.0  ;;  %v1976_v23 = vunpack.i.h.bf16 %v1974_v12 }
 0x144   : > { %v1111_v27 = vmax.f32 %v1095_v10, 0.0  ;;  %v702_v30 = vmul.f32 %v698_v21, %v692_v8 }
 0x145   : > { %v1855_v11 = vpack.c.bf16 %v1110_v25, %v1108_v24 }
 0x146   : > { %v1853_v29 = vpack.c.bf16 %v1111_v27, %v1109_v26  ;;  %v691_v26 = vunpack.c.l.bf16 %v689_v6 }
 0x148   : > { %1854 = vmatprep.subr.bf16.mxu1 %v1853_v29  ;;  %v697_v29 = vunpack.c.l.bf16 %v695_v16 }
 0x149   : > { %1856 = vmatpush1.bf16.msra.mxu1 %v1855_v11 }
 0x14c   : > { %1732 = vmatmul.mubr.msk.f32.vlgmr.msra.gmra.mrb[8].mxu1 %vm1148_vm1, %v1800_v13  ;;  %v699_v13 = vunpack.c.l.bf16 %v696_v17 }
 0x14d   : > { %1231 = vmatprep.mubr.f32.mxu1 %v2047_v9 }
 0x150   : > { %1733 = vmatmul.mubr.msk.f32.gmra.mrb[10].mxu1 %vm1148_vm1, %v1801_v14 }
 0x151   : > { %1237 = vmatprep.mubr.f32.mxu1 %v2047_v9 }
 0x154   : > { %1734 = vmatmul.mubr.msk.f32.gmra.mrb[12].mxu1 %vm1148_vm1, %v1804_v31  ;;  %v704_v31 = vmul.f32 %v700_v22, %v694_v20 }
 0x155   : > { %1243 = vmatprep.mubr.f32.mxu1 %v2047_v9 }
 0x158   : > { %1735 = vmatmul.mubr.msk.f32.gmra.mrb[14].mxu1 %vm1148_vm1, %v1805_v32 }
 0x159   : > { %1347 = vmatprep.mubr.f32.mxu1 %v2047_v9 }
 0x21f   : > { %v1227_v34 = vpop.f32.mrb[8].mxu1 }
 0x220   : > { %v1229_v36 = vpop.f32.mrb[9].mxu1  ;;  %v1228_v38 = vadd.f32 %v1965_v35, %v1227_v34 }
 0x221   : > { %v1230_v39 = vadd.f32 %v1965_v35, %v1229_v36 }
 0x222   : > { %v1250_v44 = vmax.f32 %v1228_v38, 0.0  ;;  %v701_v38 = vmul.f32 %v697_v29, %v691_v26 }
 0x223   : > { %v1233_v40 = vpop.f32.mrb[10].mxu1  ;;  %v1251_v47 = vmax.f32 %v1230_v39, 0.0  ;;  %v703_v39 = vmul.f32 %v699_v13, %v693_v28 }
 0x224   : > { %v1234_v41 = vadd.f32 %v1966_v37, %v1233_v40  ;;  %v1235_v42 = vpop.f32.mrb[11].mxu1 }
 0x225   : > { %v1236_v43 = vadd.f32 %v1966_v37, %v1235_v42  ;;  %v1366_v37 = vld [vmem:[%s2396_s12] sm:$0x1] }
 0x226   : > { %v1252_v45 = vmax.f32 %v1234_v41, 0.0  ;;  %v1869_v41 = vpack.c.bf16 %v704_v31, %v702_v30  ;;  %v1367_v42 = vunpack.c.l.bf16 %v1366_v37 }
 0x227   : > { %v1253_v48 = vmax.f32 %v1236_v43, 0.0  ;;  %v1239_v49 = vpop.f32.mrb[12].mxu1  ;;  %v1871_v43 = vpack.c.bf16 %v703_v39, %v701_v38 }
 0x228   : > { %v1859_v51 = vpack.c.bf16 %v1252_v45, %v1250_v44  ;;  %v1241_v52 = vpop.f32.mrb[13].mxu1  ;;  %v1240_v55 = vadd.f32 %v1970_v50, %v1239_v49  ;;  %v1364_v44 = vld [vmem:[%s2395_s11] sm:$0x1] }
 0x229   : > { %v1857_v53 = vpack.c.bf16 %v1253_v48, %v1251_v47  ;;  %v1242_v56 = vadd.f32 %v1970_v50, %v1241_v52  ;;  %v1365_v45 = vunpack.c.l.bf16 %v1364_v44  ;;  %v1524_v47 = vunpack.c.l.s4 %v2049_v46  ;;  %v1521_v52 = vpop.permute.xlu1 %1520 }
 0x22a   : > { %v1254_v61 = vmax.f32 %v1240_v55, 0.0  ;;  %v1526_v48 = vlaneseq }
 0x22b   : > { %v1245_v57 = vpop.f32.mrb[14].mxu1  ;;  %1858 = vmatprep.subr.bf16.mxu1 %v1857_v53  ;;  %v1255_v63 = vmax.f32 %v1242_v56, 0.0  ;;  %v1525_v49 = vunpack.c.0.s8 %v1524_v47  ;;  %v2050_v53 = vmov 1966171168  }
 0x22c   : > { %v1246_v58 = vadd.f32 %v1971_v54, %v1245_v57  ;;  %v1247_v59 = vpop.f32.mrb[15].mxu1  ;;  %1860 = vmatpush1.bf16.msra.mxu1 %v1859_v51  ;;  %v1527_v50 = vshrl.u32 %v1526_v48, 7  ;;  %vm1558_vm3 = vcmp.lt.s32.totalorder %v1526_v48, 256 }
 0x22d   : > { %v1248_v60 = vadd.f32 %v1971_v54, %v1247_v59  ;;  %v1542_v54 = vunpack.c.l.s4 %v2050_v53 }
 0x22e   : > { %v1256_v62 = vmax.f32 %v1246_v58, 0.0  ;;  %v1528_v51 = vsub.s32 %v1525_v49, %v1527_v50 }
 0x22f   : > { %v1257_v0 = vmax.f32 %v1248_v60, 0.0  ;;  %v1543_v56 = vunpack.c.0.s8 %v1542_v54 }
 0x230   : > { %v1863_v1 = vpack.c.bf16 %v1256_v62, %v1254_v61  ;;  %v1529_v55 = vrot.slane %v1521_v52, %v1528_v51 }
 0x231   : > { %v1861_v3 = vpack.c.bf16 %v1257_v0, %v1255_v63  ;;  %v1546_v62 = vsub.s32 %v1543_v56, %v1527_v50 }
 0x233   : > { %1862 = vmatprep.subr.bf16.mxu1 %v1861_v3 }
 0x234   : > { %1864 = vmatpush1.bf16.msra.mxu1 %v1863_v1 }
 0x237   : > { %1736 = vmatmul.mubr.msk.f32.vlgmr.msra.gmra.mrb[16].mxu1 %vm1276_vm2, %v1816_v4 }
 0x238   : > { %1353 = vmatprep.mubr.f32.mxu1 %v2047_v9 }
 0x23b   : > { %1737 = vmatmul.mubr.msk.f32.gmra.mrb[18].mxu1 %vm1276_vm2, %v1817_v5 }
 0x23c   : > { %1435 = vmatprep.mubr.f32.mxu1 %v2047_v9 }
 0x30a   : > { %v1349_v7 = vpop.f32.mrb[16].mxu1 }
 0x30b   : > { %v1351_v19 = vpop.f32.mrb[17].mxu1  ;;  %v1350_v10 = vadd.f32 %v1975_v18, %v1349_v7 }
 0x30c   : > { %v1352_v24 = vadd.f32 %v1975_v18, %v1351_v19 }
 0x30d   : > { %v1360_v32 = vmax.f32 %v1350_v10, 0.0 }
 0x30e   : > { %v1355_v25 = vpop.f32.mrb[18].mxu1  ;;  %v1361_v34 = vmax.f32 %v1352_v24, 0.0 }
 0x30f   : > { %v1356_v27 = vadd.f32 %v1976_v23, %v1355_v25  ;;  %v1357_v11 = vpop.f32.mrb[19].mxu1 }
 0x310   : > { %v1358_v14 = vadd.f32 %v1976_v23, %v1357_v11 }
 0x311   : > { %v1362_v33 = vmax.f32 %v1356_v27, 0.0 }
 0x312   : > { %v1363_v35 = vmax.f32 %v1358_v14, 0.0 }
 0x313   : > { %v1867_v36 = vpack.c.bf16 %v1362_v33, %v1360_v32 }
 0x314   : > { %v1865_v40 = vpack.c.bf16 %v1363_v35, %v1361_v34 }
 0x316   : > { %1866 = vmatprep.subr.bf16.mxu1 %v1865_v40 }
 0x317   : > { %1868 = vmatpush1.bf16.msra.mxu1 %v1867_v36 }
 0x318   : > { %1870 = vmatprep.subr.bf16.mxu1 %v1869_v41 }
 0x31a   : > { %1738 = vmatmul.mubr.msk.f32.vlgmr.msra.gmra.mrb[20].mxu1 %vm749_vm0, %v1367_v42 }
 0x31b   : > { %1872 = vmatpush1.bf16.msra.mxu1 %v1871_v43  ;;  %1509 = vmatprep.mubr.f32.mxu1 %v2047_v9  ;;  %v1533_v9 = vsub.s32 0, %v1527_v50 }
 0x31d   : > { %v1534_v57 = vrot.slane %v1529_v55, %v1533_v9 }
 0x322   : > { %1739 = vmatmul.mubr.msk.f32.vlgmr.msra.gmra.mrb[20].mxu1 %vm749_vm0, %v1365_v45 }
 0x3f5   : > { %v1511_v58 = vpop.f32.mrb[20].mxu1 }
 0x3f6   : > { %v1536_v59 = vadd.f32 %v1534_v57, %v1511_v58  ;;  %v1513_v60 = vpop.f32.mrb[21].mxu1 }
 0x3f7   : > { %v1537_v61 = vadd.f32 %v1534_v57, %v1513_v60 }
 0x3f9   : > { %v1540_v63 = vcombine.low %v1536_v59, %v1537_v61 }
 0x3fb   : > { %v1547_v0 = vrot.slane %v1540_v63, %v1546_v62 }
 0x3fd   : > { %v1554_v1 = vrot.slane %v1547_v0, %v1546_v62 }
 0x3ff   : > { %1560 = vst.msk [vmem:[%s683_s22] sm:$0x3] %vm1558_vm3, %v1554_v1 }
 0x400   : > { %1996 = shalt.err (!%p1993_p5)
}
 0x401   : > { %s1997_s24 = scalar_lea.hbm %s2340_s26, 32  ;;  %s2001_s22 = scalar_lea.hbm %s2398_s14, 64 }
 0x402   : > { %p1998_p7 = scmp.ne.s32.totalorder %s2340_s26, %s1997_s24  ;;  %p2002_p12 = scmp.lt.u32.totalorder %s2340_s26, %s2398_s14 }
 0x403   : > { %p2003_p13 = scmp.lt.u32.totalorder %s2001_s22, %s1997_s24  ;;  %p2005_p1 = scmp.lt.u32.totalorder %s1997_s24, %s2340_s26 }
 0x404   : > { %p1999_p10 = pnand %p1998_p7, %p2172_p6 }
 0x405   : > { %p2004_p0 = por %p2003_p13, %p2002_p12 }
 0x406   : > { %p2000_p11 = pneg %p1999_p10 }
 0x407   : > { %p2006_p2 = por %p2005_p1, %p2004_p0 }
 0x409   : > { %p2007_p3 = pnand %p2006_p2, %p2000_p11 }
 0x40b   : > { %2010 = shalt.err (!%p2007_p3)
}
 0x40c   : > { %1897 = dma.vmem_to_hbm [thread:$0]  (%p2172_p6), %s2342_s23, 32, %s2340_s26, %s1562_s21  }
 0x40d PF: > { %s2412_s27 = sld [smem:[#allocation10_spill]]  ;;  %p1900_p4 = pnand %p1697_p9, %p2176_p8 }
 0x413   : > { %s1588_s29 = sand.u32 1, %s2412_s27  }
 0x414   : > { %s1589_s30 = scalar_lea.sflag [#allocation8], %s1588_s29 }
 0x415   : > { %2028 = dma.done.wait (!%p1900_p4), %s1589_s30, 32  }
 0x416   : > { %2030 = vsyncadd (!%p1900_p4), %s1589_s30, 4294967264  ;;  %s2414_s18 = sld [smem:[#allocation11_spill]]  ;;  %s2415_s24 = sld [smem:[#allocation12_spill]] }
 0x417   : > { %s2416_s15 = smov %s2037_s16  ;;  %s2417_s16 = smov %s2041_s17 }
 0x41c   : > { %p26_p5 = scmp.ge.s32.totalorder %s2414_s18, 4   ;;  %s2418_s17 = smov %s2415_s24 }
 0x41e   :  { %28 = sbr.rel (!%p26_p5) target bundleno = 6 (0x6), region = 292 }
 0x425   :  { %1594 = vsyncpa [#allocation8], 1 }
 0x426   :  { %1596 = vsyncpa [#allocation8 + $0x1], 1 }

</bundles_post_ra>
